<compile_context>
chip_gen: v7x
topology: tpu7x:2x2x1
jax: 0.10.0
libtpu: 0.0.40
codegen_flags: <defaults>
</compile_context>

<pallas_src>
import numpy as np

import jax
import jax.numpy as jnp
from jax.experimental import pallas as pl
from jax.experimental.pallas import tpu as pltpu


_TARGET_TILE_BYTES = 4 * 1024 * 1024   # per-buffer tile budget (dtype-aware)
_MAX_LANES = 8192                      # widest lane (last-dim) width considered
_VMEM_LIMIT_BYTES = 32 * 1024 * 1024   # safe on v5e/v6e/v7x (16 MiB actually used)


def _identity_kernel(x_ref, o_ref):
    # Forward of the (abstract) BaseModel: no parameters, no transform.
    o_ref[...] = x_ref[...]


def _choose_lanes(total: int):
    """Widest lane width (multiple of 128, <= _MAX_LANES) dividing `total`.

    Prefers widths that leave at least 8 rows; returns None if `total` is not
    divisible by 128 at all (caller pads in that case).
    """
    best_any = None
    best_rows8 = None
    lanes = 128
    limit = min(total, _MAX_LANES)
    while lanes <= limit:
        if total % lanes == 0:
            best_any = lanes
            if total // lanes >= 8:
                best_rows8 = lanes
        lanes += 128
    return best_rows8 if best_rows8 is not None else best_any


def _choose_tile_rows(rows: int, lanes: int, itemsize: int) -> int:
    """Byte-budgeted row tile: multiple of 8, prefers dividing `rows`,
    and guarantees >= 2 grid steps when rows >= 16 (v7x dual-TC sharding)."""
    budget_rows = max(8, _TARGET_TILE_BYTES // (lanes * itemsize))
    tile_r = min(budget_rows, rows)
    if tile_r >= rows:
        if rows >= 16:
            # Cap at ~rows//2 so the 'parallel' axis has >= 2 grid points.
            tile_r = max(8, (rows // 2) // 8 * 8)
        else:
            return rows                    # full-extent block, always legal
    # tile_r < rows: block sublane dim must be a multiple of 8.
    tile_r = max(8, (tile_r // 8) * 8)
    # Prefer a tile that divides rows exactly (no masked final store).
    for t in range(tile_r, 7, -8):
        if rows % t == 0:
            return t
    return tile_r                          # ragged last block: Pallas masks it


def _tiled_identity(x2: jax.Array) -> jax.Array:
    """Lane-dense, pipelined identity copy of a (rows, lanes) array."""
    rows, lanes = x2.shape
    tile_r = _choose_tile_rows(rows, lanes, x2.dtype.itemsize)
    grid_r = pl.cdiv(rows, tile_r)
    return pl.pallas_call(
        _identity_kernel,
        out_shape=jax.ShapeDtypeStruct((rows, lanes), x2.dtype),
        grid_spec=pl.GridSpec(
            grid=(grid_r,),
            in_specs=[pl.BlockSpec((tile_r, lanes), lambda i: (i, 0))],
            out_specs=pl.BlockSpec((tile_r, lanes), lambda i: (i, 0)),
        ),
        input_output_aliases={0: 0},
        compiler_params=pltpu.CompilerParams(
            dimension_semantics=("parallel",),
            vmem_limit_bytes=_VMEM_LIMIT_BYTES,
        ),
    )(x2)


def _forward_impl(x: jax.Array) -> jax.Array:
    """Pallas 'forward' for BaseModel: identity pass-through on TPU."""
    orig_shape = x.shape
    total = int(np.prod(orig_shape)) if len(orig_shape) > 0 else 1

    # Degenerate inputs: nothing worth launching a kernel for.
    if x.ndim == 0 or total == 0:
        return x

    lanes = _choose_lanes(total)
    if lanes is None:
        # Element count not divisible by 128: pad the flattened vector up to a
        # multiple of 128, route through the same tiled lane-dense path, slice.
        padded = ((total + 127) // 128) * 128
        flat = jnp.pad(x.reshape(total), (0, padded - total))
        lanes_p = _choose_lanes(padded)
        rows_p = padded // lanes_p
        out_flat = _tiled_identity(flat.reshape(rows_p, lanes_p))
        return out_flat.reshape(padded)[:total].reshape(orig_shape)

    rows = total // lanes
    out = _tiled_identity(x.reshape(rows, lanes))   # reshape = bitcast
    return out.reshape(orig_shape)


# Primary entry point: donation pairs with input_output_aliases so the
# identity is genuinely in-place (no hidden defensive HBM copy of x).
# The caller must not reuse `x` after this call.
base_model_forward = jax.jit(_forward_impl, donate_argnums=0)

# Non-donating variant if the caller still needs `x` afterwards.
base_model_forward_keep_input = jax.jit(_forward_impl)


if __name__ == "__main__":
    key = jax.random.PRNGKey(0)
    # Small NCHW input consistent with a generic vision-style forward.
    x = jax.random.normal(key, (2, 4, 16, 16), dtype=jnp.float32)
    x_host = np.asarray(x)            # snapshot before the buffer is donated

    y = base_model_forward(x)         # donates x's device buffer
    y = jax.block_until_ready(y)

    assert y.shape == x_host.shape and y.dtype == x_host.dtype
    assert np.allclose(np.asarray(y), x_host), "identity forward mismatch"
    print("KERNEL_OK")
</pallas_src>

<mosaic_0001>
module attributes {stable_mosaic.version = 11 : i64} {
  func.func @_identity_kernel(%arg0: i32, %arg1: memref<8x256xf32, #tpu.memory_space<vmem>>, %arg2: memref<8x256xf32, #tpu.memory_space<vmem>>) attributes {dimension_semantics = [#tpu.dimension_semantics<parallel>], iteration_bounds = array<i64: 1>, scalar_prefetch = 0 : i64, scratch_operands = 0 : i64, tpu.core_type = #tpu.core_type<tc>, window_params = [{transform_indices = @transform_0, window_bounds = array<i64: 8, 256>}, {transform_indices = @transform_1, window_bounds = array<i64: 8, 256>}]} {
    %c0 = arith.constant 0 : index
    %c0_0 = arith.constant 0 : index
    %0 = vector.load %arg1[%c0, %c0_0] : memref<8x256xf32, #tpu.memory_space<vmem>>, vector<8x256xf32>
    %c0_1 = arith.constant 0 : index
    %c0_2 = arith.constant 0 : index
    %1 = vector.load %arg2[%c0_1, %c0_2] : memref<8x256xf32, #tpu.memory_space<vmem>>, vector<8x256xf32>
    tpu.vector_store %arg2[%c0_1, %c0_2], %0 {strides = array<i32>} : memref<8x256xf32, #tpu.memory_space<vmem>>, vector<8x256xf32>,
    return
  }
  func.func @transform_0(%arg0: i32) -> (i32, i32) {
    %c0_i32 = arith.constant 0 : i32
    %c0_i32_0 = arith.constant 0 : i32
    return %arg0, %c0_i32 : i32, i32
  }
  func.func @transform_1(%arg0: i32) -> (i32, i32) {
    %c0_i32 = arith.constant 0 : i32
    %c0_i32_0 = arith.constant 0 : i32
    return %arg0, %c0_i32 : i32, i32
  }
}

</mosaic_0001>

<bundles_post_ra>
// kernel: _forward_impl.1
= control target key start
LH: loop header
LB: loop body
LE: loop exit
PB: predicated region body
PF: predicated region fallthrough
CT: control target
= control target key end

     0   :  { %s38_s0 = inlined_call_operand.vmem [shape: f32[8,256], index: 0, kind: input, shape index: {}, may-alias: {0,1}]   ;;  %s39_s1 = inlined_call_operand.vmem [shape: f32[8,256], index: 1, kind: output, shape index: {}, may-alias: {0,1}]  }
   0x1   :  { %v8_v0 = vld [vmem:[%s38_s0] sm:$0xff]  ;;  %v9_v1 = vld [vmem:[%s38_s0 + $0x8] sm:$0xff] }
   0x2   :  { %10 = vst [vmem:[%s39_s1] sm:$0xff] %v8_v0  ;;  %11 = vst [vmem:[%s39_s1 + $0x8] sm:$0xff] %v9_v1 }

</bundles_post_ra>
